<compile_context>
chip_gen: v6e
topology: v6e:2x2x1
jax: 0.10.0
libtpu: 0.0.40
codegen_flags: <defaults>
</compile_context>

<pallas_src>
import jax
import jax.numpy as jnp
from jax.experimental import pallas as pl
from jax.experimental.pallas import tpu as pltpu


# ----------------------------------------------------------------------------
# Static configuration (toy CLIP sizes)
# ----------------------------------------------------------------------------
B = 2                      # batch
C_IMG, H_IMG, W_IMG = 3, 16, 16
D = 32                     # vis_dim == ctx_dim == embed dim (as in CoCoOp)
N_CLS = 4                  # number of classes
L = 8                      # EFFICIENT_CONTEXT_LENGTH
GRAMLEN = 2                # cfg.TRAINER.COCOOP_ENSEMBLING_LAIONIZED.GRAMLEN
META_HID = 8               # meta_net hidden dim
TEMPLATES = [(2, 0), (1, 1), (2, 1)]   # (n_ctx_before, n_ctx_after) per template
T = len(TEMPLATES)
EPS = 1e-12                # guards zero-norm rows


# ----------------------------------------------------------------------------
# Fused forward kernel
# ----------------------------------------------------------------------------

def _fused_forward_kernel(scale_ref, img_ref, w_img_ref, w1_ref, b1_ref,
                          w2_ref, b2_ref, tproj_ref, cls_text_ref, o_ref):
    # ---- image encoder stand-in: flatten NCHW -> linear proj, L2 normalize --
    # TODO(synk): real CLIP ViT image encoder (external clip_model.visual).
    feat = jnp.dot(img_ref[...], w_img_ref[...],
                   preferred_element_type=jnp.float32)                 # (B, D)
    imf = feat * jax.lax.rsqrt(
        jnp.sum(feat * feat, axis=-1, keepdims=True) + EPS)            # (B, D)

    # ---- all T meta-nets in two matmuls (layers packed block-diagonally) ----
    h = jnp.maximum(
        jnp.dot(imf, w1_ref[...], preferred_element_type=jnp.float32)
        + b1_ref[...], 0.0)                                            # (B, T*H)
    # second layer already folds the CoCoOp pooling scale nctx/(nctx+4);
    # only the bias columns (meta_out[:, :vis_dim]) are used in eval.
    bias_pool = (jnp.dot(h, w2_ref[...], preferred_element_type=jnp.float32)
                 + b2_ref[...])                                        # (B, T*D)

    # ---- text projection of the image-conditioned part of every template ----
    # TODO(synk): real CLIP text transformer (EfficientTextEncoder); stood in
    # by mean-pool over valid prompt tokens + linear projection, split by
    # linearity into a precomputed class part and this per-batch part.
    bias_text = jnp.dot(bias_pool, tproj_ref[...],
                        preferred_element_type=jnp.float32)            # (B, T*D)

    cls_text = cls_text_ref[...]                                       # (T*C, D)

    # ---- per-template text features, L2 norm, ensemble accumulation ---------
    acc = jnp.zeros((B, N_CLS, D), jnp.float32)
    for t in range(T):
        bt = bias_text[:, t * D:(t + 1) * D]                           # (B, D)
        ct = cls_text[t * N_CLS:(t + 1) * N_CLS, :]                    # (C, D)
        tf = ct[None, :, :] + bt[:, None, :]                           # (B, C, D)
        tf = tf * jax.lax.rsqrt(
            jnp.sum(tf * tf, axis=-1, keepdims=True) + EPS)            # per-row L2
        acc = acc + tf

    # ---- ensemble head: mean over templates -> renorm -> cosine -> scale ----
    mean_tf = acc * (1.0 / float(T))
    tnorm = mean_tf * jax.lax.rsqrt(
        jnp.sum(mean_tf * mean_tf, axis=-1, keepdims=True) + EPS)
    cos = jnp.sum(tnorm * imf[:, None, :], axis=-1)                    # (B, C)
    o_ref[...] = scale_ref[0, 0] * cos


def _forward_impl(scale, img_flat, w_img, w1, b1, w2_blk, b2_blk, tproj_blk,
                  cls_text):
    in_specs = ([pl.BlockSpec(memory_space=pltpu.MemorySpace.SMEM)]     # scale
                + [pl.BlockSpec(memory_space=pltpu.MemorySpace.VMEM)] * 8)
    return pl.pallas_call(
        _fused_forward_kernel,
        out_shape=jax.ShapeDtypeStruct((B, N_CLS), jnp.float32),
        in_specs=in_specs,
        out_specs=pl.BlockSpec(memory_space=pltpu.MemorySpace.VMEM),
    )(scale, img_flat, w_img, w1, b1, w2_blk, b2_blk, tproj_blk, cls_text)


_forward_jit = jax.jit(_forward_impl)


def forward(packed, image):
    """Fused eval forward. image: (B, 3, 16, 16) -> logits (B, N_CLS)."""
    img_flat = image.reshape(B, C_IMG * H_IMG * W_IMG).astype(jnp.float32)
    return _forward_jit(packed["scale"], img_flat, packed["w_img"],
                        packed["w1"], packed["b1"], packed["w2_blk"],
                        packed["b2_blk"], packed["tproj_blk"],
                        packed["cls_text"])


# ----------------------------------------------------------------------------
# Model parameters (synthetic, deterministic)
# ----------------------------------------------------------------------------

def make_params(key):
    ks = iter(jax.random.split(key, 64))
    nrm = lambda shape, s=0.02: (s * jax.random.normal(next(ks), shape)
                                 ).astype(jnp.float32)
    p = {}
    # stand-in image encoder (CLIP visual)  # TODO(synk): full ViT image encoder
    p["w_img"] = nrm((C_IMG * H_IMG * W_IMG, D))
    # shared token-embedding rows used by every learner's prefix/suffix buffers
    p["sos"] = nrm((D,))
    p["cls_emb"] = nrm((N_CLS, D))
    p["period"] = nrm((D,))
    p["eos"] = nrm((D,))
    p["pad"] = nrm((D,))
    # shared text projection (part of the CLIP text encoder)
    p["text_proj"] = nrm((D, D))
    # per-template prompt learners
    p["learners"] = []
    for (nb, na) in TEMPLATES:
        lp = {
            "ctx_before": nrm((nb, D)),
            "ctx_after": nrm((na, D)) if na > 0 else None,
            "meta_w1": nrm((D, META_HID)),
            "meta_b1": jnp.zeros((META_HID,), jnp.float32),
            "meta_w2": nrm((META_HID, D * (GRAMLEN + 1))),
            "meta_b2": jnp.zeros((D * (GRAMLEN + 1),), jnp.float32),
        }
        p["learners"].append(lp)
    # CLIP logit scale: log(1/0.07)
    p["logit_scale"] = jnp.float32(jnp.log(1.0 / 0.07))
    return p


def pack_params(p):
    """One-time packing of module parameters into kernel-ready arrays.

    All parameter-only computation (prompt-token constant pooling, its text
    projection, block-diagonal layer packing, CoCoOp pooling scale) is folded
    here so the per-forward kernel only does image-dependent work.
    """
    learners = p["learners"]
    spec_sum = p["sos"] + p["period"] + p["eos"]                       # (D,)

    # first meta-net layer batched across templates: (D, T*H), (1, T*H)
    w1 = jnp.concatenate([lp["meta_w1"] for lp in learners], axis=1)
    b1 = jnp.concatenate([lp["meta_b1"] for lp in learners]).reshape(1, T * META_HID)

    # second layer (bias columns only) packed block-diagonally, with the
    # per-template pooling scale nctx/(nctx+4) folded in.
    w2_blk = jnp.zeros((T * META_HID, T * D), jnp.float32)
    b2_blk = jnp.zeros((1, T * D), jnp.float32)
    cls_rows = []
    for t, (nb, na) in enumerate(TEMPLATES):
        lp = learners[t]
        nctx = nb + na
        inv_count = 1.0 / float(nctx + 4)
        s_t = float(nctx) * inv_count
        w2_blk = w2_blk.at[t * META_HID:(t + 1) * META_HID,
                           t * D:(t + 1) * D].set(lp["meta_w2"][:, :D] * s_t)
        b2_blk = b2_blk.at[0, t * D:(t + 1) * D].set(lp["meta_b2"][:D] * s_t)

        # closed-form constant part of construct_prompts + mean-pool:
        #   [SOS, ctx_before, CLS, ctx_after, '.', EOS] / (nctx + 4)
        ctx_sum = jnp.sum(lp["ctx_before"], axis=0)
        if lp["ctx_after"] is not None:
            ctx_sum = ctx_sum + jnp.sum(lp["ctx_after"], axis=0)
        cls_pool = (spec_sum + ctx_sum + p["cls_emb"]) * inv_count     # (C, D)
        cls_rows.append(cls_pool @ p["text_proj"])                     # (C, D)

    return {
        "w_img": p["w_img"],
        "w1": w1,
        "b1": b1,
        "w2_blk": w2_blk,                                              # (T*H, T*D)
        "b2_blk": b2_blk,                                              # (1, T*D)
        # text projection replicated block-diagonally so all templates project
        # their image-conditioned bias in a single matmul.
        "tproj_blk": jnp.kron(jnp.eye(T, dtype=jnp.float32),
                              p["text_proj"]).astype(jnp.float32),     # (T*D, T*D)
        "cls_text": jnp.concatenate(cls_rows, axis=0),                 # (T*C, D)
        "scale": jnp.exp(p["logit_scale"]).reshape(1, 1).astype(jnp.float32),
    }


# ----------------------------------------------------------------------------
# Pure-JAX reference (mirrors the original build_prompts + mean-pool path)
# ----------------------------------------------------------------------------

def reference_forward(p, image):
    img_flat = image.reshape(B, -1).astype(jnp.float32)
    feat = img_flat @ p["w_img"]
    imf = feat / jnp.linalg.norm(feat, axis=-1, keepdims=True)

    def bcast(v, n):
        return jnp.broadcast_to(v.reshape(1, 1, 1, D), (B, N_CLS, n, D))

    tfs = []
    for (nb, na), lp in zip(TEMPLATES, p["learners"]):
        h = jnp.maximum(imf @ lp["meta_w1"] + lp["meta_b1"], 0.0)
        meta_out = h @ lp["meta_w2"] + lp["meta_b2"]
        bias = meta_out[:, :D]
        rows = [bcast(p["sos"], 1)]
        ctx_b = lp["ctx_before"][None, :, :] + bias[:, None, :]
        rows.append(jnp.broadcast_to(ctx_b[:, None, :, :], (B, N_CLS, nb, D)))
        rows.append(jnp.broadcast_to(p["cls_emb"][None, :, None, :],
                                     (B, N_CLS, 1, D)))
        if na > 0:
            ctx_a = lp["ctx_after"][None, :, :] + bias[:, None, :]
            rows.append(jnp.broadcast_to(ctx_a[:, None, :, :], (B, N_CLS, na, D)))
        rows.append(bcast(p["period"], 1))
        rows.append(bcast(p["eos"], 1))
        used = 1 + nb + 1 + na + 2
        if L - used > 0:
            rows.append(bcast(p["pad"], L - used))
        prompts = jnp.concatenate(rows, axis=2)[:, :, :L, :]
        eot_idx = 1 + nb + 1 + na + 1
        pooled = jnp.mean(prompts[:, :, :eot_idx + 1, :], axis=2)       # (B, C, D)
        tf = pooled.reshape(B * N_CLS, D) @ p["text_proj"]
        tf = tf / jnp.linalg.norm(tf, axis=-1, keepdims=True)
        tfs.append(tf.reshape(B, N_CLS, D))
    text_features = jnp.stack(tfs, axis=1)                              # (B, T, C, D)
    mean_tf = jnp.mean(text_features, axis=1)
    tnorm = mean_tf / jnp.linalg.norm(mean_tf, axis=-1, keepdims=True)
    cos = jnp.sum(tnorm * imf[:, None, :], axis=-1)
    return jnp.exp(p["logit_scale"]) * cos


# ----------------------------------------------------------------------------
# main
# ----------------------------------------------------------------------------

if __name__ == "__main__":
    root = jax.random.PRNGKey(0)
    key_params, key_img = jax.random.split(root)

    params = make_params(key_params)
    packed = pack_params(params)

    image = jax.random.normal(key_img, (B, C_IMG, H_IMG, W_IMG),
                              dtype=jnp.float32)

    logits = forward(packed, image)
    jax.block_until_ready(logits)

    assert logits.shape == (B, N_CLS)
    assert bool(jnp.all(jnp.isfinite(logits)))

    ref = reference_forward(params, image)
    assert bool(jnp.allclose(logits, ref, rtol=1e-3, atol=1e-3)), (logits, ref)

    print("KERNEL_OK")
</pallas_src>

<mosaic_0001>
module attributes {stable_mosaic.version = 11 : i64} {
  func.func @_fused_forward_kernel(%arg0: memref<1x1xf32, #tpu.memory_space<smem>>, %arg1: memref<2x768xf32, #tpu.memory_space<vmem>>, %arg2: memref<768x32xf32, #tpu.memory_space<vmem>>, %arg3: memref<32x24xf32, #tpu.memory_space<vmem>>, %arg4: memref<1x24xf32, #tpu.memory_space<vmem>>, %arg5: memref<24x96xf32, #tpu.memory_space<vmem>>, %arg6: memref<1x96xf32, #tpu.memory_space<vmem>>, %arg7: memref<96x96xf32, #tpu.memory_space<vmem>>, %arg8: memref<12x32xf32, #tpu.memory_space<vmem>>, %arg9: memref<2x4xf32, #tpu.memory_space<vmem>>) attributes {dimension_semantics = [], scalar_prefetch = 0 : i64, scratch_operands = 0 : i64, tpu.core_type = #tpu.core_type<tc>} {
    %c0 = arith.constant 0 : index
    %c0_0 = arith.constant 0 : index
    %0 = vector.load %arg1[%c0, %c0_0] : memref<2x768xf32, #tpu.memory_space<vmem>>, vector<2x768xf32>
    %c0_1 = arith.constant 0 : index
    %c0_2 = arith.constant 0 : index
    %1 = vector.load %arg2[%c0_1, %c0_2] : memref<768x32xf32, #tpu.memory_space<vmem>>, vector<768x32xf32>
    %cst = arith.constant dense<0.000000e+00> : vector<2x32xf32>
    %2 = tpu.matmul %0, %1, %cst {dimension_numbers = #tpu.dot_dimension_numbers<[1], [0], [0], [1], [0, 0, 1, 1], [], []>} : vector<2x768xf32>, vector<768x32xf32>, vector<2x32xf32> -> vector<2x32xf32>
    %3 = arith.mulf %2, %2 : vector<2x32xf32>
    %cst_3 = arith.constant dense<0.000000e+00> : vector<2xf32>
    %4 = vector.multi_reduction <add>, %3, %cst_3 [1] : vector<2x32xf32> to vector<2xf32>
    %5 = vector.shape_cast %4 : vector<2xf32> to vector<2x1xf32>
    %cst_4 = arith.constant 9.99999996E-13 : f32
    %6 = vector.broadcast %cst_4 : f32 to vector<2x1xf32>
    %7 = arith.addf %5, %6 : vector<2x1xf32>
    %8 = math.rsqrt %7 : vector<2x1xf32>
    %9 = vector.broadcast %8 : vector<2x1xf32> to vector<2x32xf32>
    %10 = arith.mulf %2, %9 : vector<2x32xf32>
    %c0_5 = arith.constant 0 : index
    %c0_6 = arith.constant 0 : index
    %11 = vector.load %arg3[%c0_5, %c0_6] : memref<32x24xf32, #tpu.memory_space<vmem>>, vector<32x24xf32>
    %cst_7 = arith.constant dense<0.000000e+00> : vector<2x24xf32>
    %12 = tpu.matmul %10, %11, %cst_7 {dimension_numbers = #tpu.dot_dimension_numbers<[1], [0], [0], [1], [0, 0, 1, 1], [], []>} : vector<2x32xf32>, vector<32x24xf32>, vector<2x24xf32> -> vector<2x24xf32>
    %c0_8 = arith.constant 0 : index
    %c0_9 = arith.constant 0 : index
    %13 = vector.load %arg4[%c0_8, %c0_9] : memref<1x24xf32, #tpu.memory_space<vmem>>, vector<1x24xf32>
    %14 = vector.broadcast %13 : vector<1x24xf32> to vector<2x24xf32>
    %15 = arith.addf %12, %14 : vector<2x24xf32>
    %cst_10 = arith.constant 0.000000e+00 : f32
    %16 = vector.broadcast %cst_10 : f32 to vector<2x24xf32>
    %17 = arith.maximumf %15, %16 : vector<2x24xf32>
    %c0_11 = arith.constant 0 : index
    %c0_12 = arith.constant 0 : index
    %18 = vector.load %arg5[%c0_11, %c0_12] : memref<24x96xf32, #tpu.memory_space<vmem>>, vector<24x96xf32>
    %cst_13 = arith.constant dense<0.000000e+00> : vector<2x96xf32>
    %19 = tpu.matmul %17, %18, %cst_13 {dimension_numbers = #tpu.dot_dimension_numbers<[1], [0], [0], [1], [0, 0, 1, 1], [], []>} : vector<2x24xf32>, vector<24x96xf32>, vector<2x96xf32> -> vector<2x96xf32>
    %c0_14 = arith.constant 0 : index
    %c0_15 = arith.constant 0 : index
    %20 = vector.load %arg6[%c0_14, %c0_15] : memref<1x96xf32, #tpu.memory_space<vmem>>, vector<1x96xf32>
    %21 = vector.broadcast %20 : vector<1x96xf32> to vector<2x96xf32>
    %22 = arith.addf %19, %21 : vector<2x96xf32>
    %c0_16 = arith.constant 0 : index
    %c0_17 = arith.constant 0 : index
    %23 = vector.load %arg7[%c0_16, %c0_17] : memref<96x96xf32, #tpu.memory_space<vmem>>, vector<96x96xf32>
    %cst_18 = arith.constant dense<0.000000e+00> : vector<2x96xf32>
    %24 = tpu.matmul %22, %23, %cst_18 {dimension_numbers = #tpu.dot_dimension_numbers<[1], [0], [0], [1], [0, 0, 1, 1], [], []>} : vector<2x96xf32>, vector<96x96xf32>, vector<2x96xf32> -> vector<2x96xf32>
    %c0_19 = arith.constant 0 : index
    %c0_20 = arith.constant 0 : index
    %25 = vector.load %arg8[%c0_19, %c0_20] : memref<12x32xf32, #tpu.memory_space<vmem>>, vector<12x32xf32>
    %cst_21 = arith.constant 0.000000e+00 : f32
    %26 = vector.broadcast %cst_21 : f32 to vector<2x4x32xf32>
    %27 = vector.extract_strided_slice %24 {offsets = [0, 0], sizes = [2, 32], strides = [1, 1]} : vector<2x96xf32> to vector<2x32xf32>
    %28 = vector.extract_strided_slice %25 {offsets = [0, 0], sizes = [4, 32], strides = [1, 1]} : vector<12x32xf32> to vector<4x32xf32>
    %29 = vector.shape_cast %28 : vector<4x32xf32> to vector<1x4x32xf32>
    %30 = vector.shape_cast %27 : vector<2x32xf32> to vector<2x1x32xf32>
    %31 = vector.broadcast %29 : vector<1x4x32xf32> to vector<2x4x32xf32>
    %32 = vector.broadcast %30 : vector<2x1x32xf32> to vector<2x4x32xf32>
    %33 = arith.addf %31, %32 : vector<2x4x32xf32>
    %34 = arith.mulf %33, %33 : vector<2x4x32xf32>
    %cst_22 = arith.constant dense<0.000000e+00> : vector<2x4xf32>
    %35 = vector.multi_reduction <add>, %34, %cst_22 [2] : vector<2x4x32xf32> to vector<2x4xf32>
    %36 = vector.shape_cast %35 : vector<2x4xf32> to vector<2x4x1xf32>
    %cst_23 = arith.constant 9.99999996E-13 : f32
    %37 = vector.broadcast %cst_23 : f32 to vector<2x4x1xf32>
    %38 = arith.addf %36, %37 : vector<2x4x1xf32>
    %39 = math.rsqrt %38 : vector<2x4x1xf32>
    %40 = vector.broadcast %39 : vector<2x4x1xf32> to vector<2x4x32xf32>
    %41 = arith.mulf %33, %40 : vector<2x4x32xf32>
    %42 = arith.addf %26, %41 : vector<2x4x32xf32>
    %43 = vector.extract_strided_slice %24 {offsets = [0, 32], sizes = [2, 32], strides = [1, 1]} : vector<2x96xf32> to vector<2x32xf32>
    %44 = vector.extract_strided_slice %25 {offsets = [4, 0], sizes = [4, 32], strides = [1, 1]} : vector<12x32xf32> to vector<4x32xf32>
    %45 = vector.shape_cast %44 : vector<4x32xf32> to vector<1x4x32xf32>
    %46 = vector.shape_cast %43 : vector<2x32xf32> to vector<2x1x32xf32>
    %47 = vector.broadcast %45 : vector<1x4x32xf32> to vector<2x4x32xf32>
    %48 = vector.broadcast %46 : vector<2x1x32xf32> to vector<2x4x32xf32>
    %49 = arith.addf %47, %48 : vector<2x4x32xf32>
    %50 = arith.mulf %49, %49 : vector<2x4x32xf32>
    %cst_24 = arith.constant dense<0.000000e+00> : vector<2x4xf32>
    %51 = vector.multi_reduction <add>, %50, %cst_24 [2] : vector<2x4x32xf32> to vector<2x4xf32>
    %52 = vector.shape_cast %51 : vector<2x4xf32> to vector<2x4x1xf32>
    %cst_25 = arith.constant 9.99999996E-13 : f32
    %53 = vector.broadcast %cst_25 : f32 to vector<2x4x1xf32>
    %54 = arith.addf %52, %53 : vector<2x4x1xf32>
    %55 = math.rsqrt %54 : vector<2x4x1xf32>
    %56 = vector.broadcast %55 : vector<2x4x1xf32> to vector<2x4x32xf32>
    %57 = arith.mulf %49, %56 : vector<2x4x32xf32>
    %58 = arith.addf %42, %57 : vector<2x4x32xf32>
    %59 = vector.extract_strided_slice %24 {offsets = [0, 64], sizes = [2, 32], strides = [1, 1]} : vector<2x96xf32> to vector<2x32xf32>
    %60 = vector.extract_strided_slice %25 {offsets = [8, 0], sizes = [4, 32], strides = [1, 1]} : vector<12x32xf32> to vector<4x32xf32>
    %61 = vector.shape_cast %60 : vector<4x32xf32> to vector<1x4x32xf32>
    %62 = vector.shape_cast %59 : vector<2x32xf32> to vector<2x1x32xf32>
    %63 = vector.broadcast %61 : vector<1x4x32xf32> to vector<2x4x32xf32>
    %64 = vector.broadcast %62 : vector<2x1x32xf32> to vector<2x4x32xf32>
    %65 = arith.addf %63, %64 : vector<2x4x32xf32>
    %66 = arith.mulf %65, %65 : vector<2x4x32xf32>
    %cst_26 = arith.constant dense<0.000000e+00> : vector<2x4xf32>
    %67 = vector.multi_reduction <add>, %66, %cst_26 [2] : vector<2x4x32xf32> to vector<2x4xf32>
    %68 = vector.shape_cast %67 : vector<2x4xf32> to vector<2x4x1xf32>
    %cst_27 = arith.constant 9.99999996E-13 : f32
    %69 = vector.broadcast %cst_27 : f32 to vector<2x4x1xf32>
    %70 = arith.addf %68, %69 : vector<2x4x1xf32>
    %71 = math.rsqrt %70 : vector<2x4x1xf32>
    %72 = vector.broadcast %71 : vector<2x4x1xf32> to vector<2x4x32xf32>
    %73 = arith.mulf %65, %72 : vector<2x4x32xf32>
    %74 = arith.addf %58, %73 : vector<2x4x32xf32>
    %cst_28 = arith.constant 0.333333343 : f32
    %75 = vector.broadcast %cst_28 : f32 to vector<2x4x32xf32>
    %76 = arith.mulf %74, %75 : vector<2x4x32xf32>
    %77 = arith.mulf %76, %76 : vector<2x4x32xf32>
    %cst_29 = arith.constant dense<0.000000e+00> : vector<2x4xf32>
    %78 = vector.multi_reduction <add>, %77, %cst_29 [2] : vector<2x4x32xf32> to vector<2x4xf32>
    %79 = vector.shape_cast %78 : vector<2x4xf32> to vector<2x4x1xf32>
    %cst_30 = arith.constant 9.99999996E-13 : f32
    %80 = vector.broadcast %cst_30 : f32 to vector<2x4x1xf32>
    %81 = arith.addf %79, %80 : vector<2x4x1xf32>
    %82 = math.rsqrt %81 : vector<2x4x1xf32>
    %83 = vector.broadcast %82 : vector<2x4x1xf32> to vector<2x4x32xf32>
    %84 = arith.mulf %76, %83 : vector<2x4x32xf32>
    %85 = vector.shape_cast %10 : vector<2x32xf32> to vector<2x1x32xf32>
    %86 = vector.broadcast %85 : vector<2x1x32xf32> to vector<2x4x32xf32>
    %87 = arith.mulf %84, %86 : vector<2x4x32xf32>
    %cst_31 = arith.constant dense<0.000000e+00> : vector<2x4xf32>
    %88 = vector.multi_reduction <add>, %87, %cst_31 [2] : vector<2x4x32xf32> to vector<2x4xf32>
    %c0_32 = arith.constant 0 : index
    %c0_33 = arith.constant 0 : index
    %89 = memref.load %arg0[%c0_32, %c0_33] : memref<1x1xf32, #tpu.memory_space<smem>>
    %90 = vector.broadcast %89 : f32 to vector<2x4xf32>
    %91 = arith.mulf %90, %88 : vector<2x4xf32>
    %c0_34 = arith.constant 0 : index
    %c0_35 = arith.constant 0 : index
    %92 = vector.load %arg9[%c0_34, %c0_35] : memref<2x4xf32, #tpu.memory_space<vmem>>, vector<2x4xf32>
    tpu.vector_store %arg9[%c0_34, %c0_35], %91 {strides = array<i32>} : memref<2x4xf32, #tpu.memory_space<vmem>>, vector<2x4xf32>,
    return
  }
}

</mosaic_0001>

<bundles_post_ra>
// kernel: _forward_impl.1
= control target key start
LH: loop header
LB: loop body
LE: loop exit
PB: predicated region body
PF: predicated region fallthrough
CT: control target
= control target key end

     0   :  { %v1067_v30 = vmov 1983009808   ;;  %v138_v32 = vlaneseq  ;;  %s1557_s0 = inlined_call_operand.<no memory space> [shape: f32[1,1], index: 0, kind: input, shape index: {}]   ;;  %s1558_s1 = inlined_call_operand.vmem [shape: f32[2,768], index: 1, kind: input, shape index: {}]   ;;  %s1559_s2 = inlined_call_operand.vmem [shape: f32[768,32], index: 2, kind: input, shape index: {}]   ;;  %s1560_s3 = inlined_call_operand.vmem [shape: f32[32,24], index: 3, kind: input, shape index: {}]   ;;  %s1561_s4 = inlined_call_operand.vmem [shape: f32[1,24], index: 4, kind: input, shape index: {}]   ;;  %s1562_s5 = inlined_call_operand.vmem [shape: f32[24,96], index: 5, kind: input, shape index: {}]   ;;  %s1563_s6 = inlined_call_operand.vmem [shape: f32[1,96], index: 6, kind: input, shape index: {}]   ;;  %s1564_s7 = inlined_call_operand.vmem [shape: f32[96,96], index: 7, kind: input, shape index: {}]   ;;  %s1565_s8 = inlined_call_operand.vmem [shape: f32[12,32], index: 8, kind: input, shape index: {}]   ;;  %s1566_s9 = inlined_call_operand.hbm [shape: f32[2,4], index: 9, kind: output, shape index: {}]  }
   0x1   :  { %v67_v0 = vld [vmem:[%s1559_s2 + $0xf8] sm:$0xff]  ;;  %v66_v4 = vld [vmem:[%s1559_s2 + $0xf0] sm:$0xff]  ;;  %v65_v8 = vld [vmem:[%s1559_s2 + $0xe8] sm:$0xff]  ;;  %v136_v31 = vunpack.c.l.s4 %v1067_v30 }
   0x2   :  { %v99_v1 = vld [vmem:[%s1559_s2 + $0x1f8] sm:$0xff]  ;;  %845 = vmatprep.subr.mxu0 %v67_v0  ;;  %v98_v5 = vld [vmem:[%s1559_s2 + $0x1f0] sm:$0xff]  ;;  %v97_v9 = vld [vmem:[%s1559_s2 + $0x1e8] sm:$0xff]  ;;  %v1239_v42 = vshrl.u32 %v138_v32, 7 }
   0x3   :  { %v51_v2 = vld [vmem:[%s1559_s2 + $0x78] sm:$0xff]  ;;  %880 = vmatprep.subr.mxu1 %v99_v1  ;;  %v50_v6 = vld [vmem:[%s1559_s2 + $0x70] sm:$0xff]  ;;  %v49_v10 = vld [vmem:[%s1559_s2 + $0x68] sm:$0xff]  ;;  %v137_v41 = vunpack.c.0.s8 %v136_v31 }
   0x4   :  { %v83_v3 = vld [vmem:[%s1559_s2 + $0x178] sm:$0xff]  ;;  %846 = vmatpush3.msra.mxu0 %v51_v2  ;;  %v82_v7 = vld [vmem:[%s1559_s2 + $0x170] sm:$0xff]  ;;  %v81_v11 = vld [vmem:[%s1559_s2 + $0x168] sm:$0xff] }
   0x5   :  { %881 = vmatpush3.msra.mxu1 %v83_v3  ;;  %847 = vmatprep.subr.mxu0 %v66_v4  ;;  %v64_v12 = vld [vmem:[%s1559_s2 + $0xe0] sm:$0xff]  ;;  %v63_v16 = vld [vmem:[%s1559_s2 + $0xd8] sm:$0xff]  ;;  %v62_v20 = vld [vmem:[%s1559_s2 + $0xd0] sm:$0xff]  ;;  %v140_v51 = vsub.s32 %v137_v41, %v1239_v42 }
   0x6   :  { %882 = vmatprep.subr.mxu1 %v98_v5  ;;  %848 = vmatpush3.msra.mxu0 %v50_v6  ;;  %v96_v13 = vld [vmem:[%s1559_s2 + $0x1e0] sm:$0xff]  ;;  %v95_v17 = vld [vmem:[%s1559_s2 + $0x1d8] sm:$0xff]  ;;  %v94_v21 = vld [vmem:[%s1559_s2 + $0x1d0] sm:$0xff] }
   0x7   :  { %883 = vmatpush3.msra.mxu1 %v82_v7  ;;  %849 = vmatprep.subr.mxu0 %v65_v8  ;;  %v48_v14 = vld [vmem:[%s1559_s2 + $0x60] sm:$0xff]  ;;  %v47_v18 = vld [vmem:[%s1559_s2 + $0x58] sm:$0xff]  ;;  %v46_v22 = vld [vmem:[%s1559_s2 + $0x50] sm:$0xff] }
   0x8   :  { %884 = vmatprep.subr.mxu1 %v97_v9  ;;  %v80_v15 = vld [vmem:[%s1559_s2 + $0x160] sm:$0xff]  ;;  %850 = vmatpush3.msra.mxu0 %v49_v10  ;;  %v79_v19 = vld [vmem:[%s1559_s2 + $0x158] sm:$0xff]  ;;  %v78_v23 = vld [vmem:[%s1559_s2 + $0x150] sm:$0xff] }
   0x9   :  { %885 = vmatpush3.msra.mxu1 %v81_v11  ;;  %851 = vmatprep.subr.mxu0 %v64_v12  ;;  %v61_v24 = vld [vmem:[%s1559_s2 + $0xc8] sm:$0xff]  ;;  %v60_v28 = vld [vmem:[%s1559_s2 + $0xc0] sm:$0xff]  ;;  %v59_v35 = vld [vmem:[%s1559_s2 + $0xb8] sm:$0xff] }
   0xa   :  { %886 = vmatprep.subr.mxu1 %v96_v13  ;;  %852 = vmatpush3.msra.mxu0 %v48_v14  ;;  %v93_v25 = vld [vmem:[%s1559_s2 + $0x1c8] sm:$0xff]  ;;  %v92_v29 = vld [vmem:[%s1559_s2 + $0x1c0] sm:$0xff]  ;;  %v91_v36 = vld [vmem:[%s1559_s2 + $0x1b8] sm:$0xff] }
   0xb   :  { %887 = vmatpush3.msra.mxu1 %v80_v15  ;;  %853 = vmatprep.subr.mxu0 %v63_v16  ;;  %v45_v26 = vld [vmem:[%s1559_s2 + $0x48] sm:$0xff]  ;;  %v44_v33 = vld [vmem:[%s1559_s2 + $0x40] sm:$0xff]  ;;  %v43_v37 = vld [vmem:[%s1559_s2 + $0x38] sm:$0xff] }
   0xc   :  { %888 = vmatprep.subr.mxu1 %v95_v17  ;;  %854 = vmatpush3.msra.mxu0 %v47_v18  ;;  %v77_v27 = vld [vmem:[%s1559_s2 + $0x148] sm:$0xff]  ;;  %v76_v34 = vld [vmem:[%s1559_s2 + $0x140] sm:$0xff]  ;;  %v75_v38 = vld [vmem:[%s1559_s2 + $0x138] sm:$0xff] }
   0xd   :  { %889 = vmatpush3.msra.mxu1 %v79_v19  ;;  %855 = vmatprep.subr.mxu0 %v62_v20  ;;  %v58_v39 = vld [vmem:[%s1559_s2 + $0xb0] sm:$0xff]  ;;  %v57_v45 = vld [vmem:[%s1559_s2 + $0xa8] sm:$0xff]  ;;  %v56_v49 = vld [vmem:[%s1559_s2 + $0xa0] sm:$0xff] }
   0xe   :  { %890 = vmatprep.subr.mxu1 %v94_v21  ;;  %856 = vmatpush3.msra.mxu0 %v46_v22  ;;  %v90_v40 = vld [vmem:[%s1559_s2 + $0x1b0] sm:$0xff]  ;;  %v89_v46 = vld [vmem:[%s1559_s2 + $0x1a8] sm:$0xff]  ;;  %v88_v50 = vld [vmem:[%s1559_s2 + $0x1a0] sm:$0xff] }
   0xf   :  { %891 = vmatpush3.msra.mxu1 %v78_v23  ;;  %857 = vmatprep.subr.mxu0 %v61_v24  ;;  %v42_v43 = vld [vmem:[%s1559_s2 + $0x30] sm:$0xff]  ;;  %v41_v47 = vld [vmem:[%s1559_s2 + $0x28] sm:$0xff]  ;;  %v40_v52 = vld [vmem:[%s1559_s2 + $0x20] sm:$0xff] }
  0x10   :  { %892 = vmatprep.subr.mxu1 %v93_v25  ;;  %858 = vmatpush3.msra.mxu0 %v45_v26  ;;  %v74_v44 = vld [vmem:[%s1559_s2 + $0x130] sm:$0xff]  ;;  %v73_v48 = vld [vmem:[%s1559_s2 + $0x128] sm:$0xff]  ;;  %v72_v53 = vld [vmem:[%s1559_s2 + $0x120] sm:$0xff] }
  0x11   :  { %893 = vmatpush3.msra.mxu1 %v77_v27  ;;  %859 = vmatprep.subr.mxu0 %v60_v28  ;;  %v34_v54 = vld [vmem:[%s1558_s1] sm:$0xff]  ;;  %v55_v55 = vld [vmem:[%s1559_s2 + $0x98] sm:$0xff]  ;;  %v54_v60 = vld [vmem:[%s1559_s2 + $0x90] sm:$0xff] }
  0x12   :  { %894 = vmatprep.subr.mxu1 %v92_v29  ;;  %860 = vmatpush3.msra.mxu0 %v44_v33  ;;  %v87_v56 = vld [vmem:[%s1559_s2 + $0x198] sm:$0xff]  ;;  %v134_v57 = vcombine.high %v34_v54, %v34_v54  ;;  %v86_v61 = vld [vmem:[%s1559_s2 + $0x190] sm:$0xff]  ;;  %v141_v62 = vrot.slane %v34_v54, %v140_v51  ;;  %v53_v2 = vld [vmem:[%s1559_s2 + $0x88] sm:$0xff] }
  0x13   :  { %895 = vmatpush3.msra.mxu1 %v76_v34  ;;  %861 = vmatprep.subr.mxu0 %v59_v35  ;;  %v39_v58 = vld [vmem:[%s1559_s2 + $0x18] sm:$0xff]  ;;  %v38_v63 = vld [vmem:[%s1559_s2 + $0x10] sm:$0xff]  ;;  %v85_v3 = vld [vmem:[%s1559_s2 + $0x188] sm:$0xff] }
  0x14   :  { %896 = vmatprep.subr.mxu1 %v91_v36  ;;  %862 = vmatpush3.msra.mxu0 %v43_v37  ;;  %v71_v59 = vld [vmem:[%s1559_s2 + $0x118] sm:$0xff]  ;;  %v70_v0 = vld [vmem:[%s1559_s2 + $0x110] sm:$0xff]  ;;  %v148_v1 = vrot.slane %v134_v57, %v140_v51  ;;  %v37_v4 = vld [vmem:[%s1559_s2 + $0x8] sm:$0xff]  ;;  %v149_v8 = vcombine.high %v141_v62, %v141_v62 }
  0x15   :  { %897 = vmatpush3.msra.mxu1 %v75_v38  ;;  %863 = vmatprep.subr.mxu0 %v58_v39  ;;  %v69_v5 = vld [vmem:[%s1559_s2 + $0x108] sm:$0xff]  ;;  %v52_v6 = vld [vmem:[%s1559_s2 + $0x80] sm:$0xff]  ;;  %v131_v12 = vld [vmem:[%s1559_s2 + $0x2f8] sm:$0xff] }
  0x16   :  { %898 = vmatprep.subr.mxu1 %v90_v40  ;;  %864 = vmatpush3.msra.mxu0 %v42_v43  ;;  %v84_v7 = vld [vmem:[%s1559_s2 + $0x180] sm:$0xff]  ;;  %v150_v10 = vcombine.high %v148_v1, %v148_v1  ;;  %v1329_v13 = vld.sshfl [vmem:[%s1558_s1 + $0x8] sm:$0x33 pattern:$0x76325410]  ;;  %v115_v14 = vld [vmem:[%s1559_s2 + $0x278] sm:$0xff] }
  0x17   :  { %899 = vmatpush3.msra.mxu1 %v74_v44  ;;  %865 = vmatprep.subr.mxu0 %v57_v45  ;;  %v36_v9 = vld [vmem:[%s1559_s2] sm:$0xff]  ;;  %v158_v15 = vcombine.high %v1329_v13, %v1329_v13 }
  0x18   :  { %900 = vmatprep.subr.mxu1 %v89_v46  ;;  %866 = vmatpush3.msra.mxu0 %v41_v47  ;;  %v68_v11 = vld [vmem:[%s1559_s2 + $0x100] sm:$0xff] }
  0x19   :  { %901 = vmatpush3.msra.mxu1 %v73_v48  ;;  %867 = vmatprep.subr.mxu0 %v56_v49 }
  0x1a   :  { %902 = vmatprep.subr.mxu1 %v88_v50  ;;  %868 = vmatpush3.msra.mxu0 %v40_v52 }
  0x1b   :  { %903 = vmatpush3.msra.mxu1 %v72_v53  ;;  %869 = vmatprep.subr.mxu0 %v55_v55 }
  0x1c   :  { %904 = vmatprep.subr.mxu1 %v87_v56  ;;  %870 = vmatpush3.msra.mxu0 %v39_v58 }
  0x1d   :  { %905 = vmatpush3.msra.mxu1 %v71_v59  ;;  %871 = vmatprep.subr.mxu0 %v54_v60 }
  0x1e   :  { %906 = vmatprep.subr.mxu1 %v86_v61  ;;  %872 = vmatpush3.msra.mxu0 %v38_v63 }
  0x1f   :  { %907 = vmatpush3.msra.mxu1 %v70_v0  ;;  %873 = vmatprep.subr.mxu0 %v53_v2 }
  0x20   :  { %908 = vmatprep.subr.mxu1 %v85_v3  ;;  %874 = vmatpush3.msra.mxu0 %v37_v4 }
  0x21   :  { %909 = vmatpush3.msra.mxu1 %v69_v5  ;;  %875 = vmatprep.subr.mxu0 %v52_v6 }
  0x22   :  { %910 = vmatprep.subr.mxu1 %v84_v7  ;;  %876 = vmatpush3.msra.mxu0 %v36_v9 }
  0x23   :  { %229 = vmatprep.mubr.f32.mxu0 %v149_v8  ;;  %911 = vmatpush3.msra.mxu1 %v68_v11 }
  0x24   :  { %299 = vmatprep.mubr.f32.mxu1 %v150_v10 }
  0x25   :  { %15 = vsyncpa [#allocation4], 0  ;;  %230 = vmatmul.mubr.f32.vlgmr.msra.gmra.mxu0 %v141_v62  ;;  %300 = vmatmul.mubr.f32.vlgmr.msra.gmra.mxu1 %v148_v1  ;;  %v130_v16 = vld [vmem:[%s1559_s2 + $0x2f0] sm:$0xff]  ;;  %v129_v18 = vld [vmem:[%s1559_s2 + $0x2e8] sm:$0xff]  ;;  %vm376_vm0 = vcmask 254976   ;;  %v1068_v62 = vmov 0.0  }
  0x26   :  { %915 = vmatprep.subr.mxu0 %v131_v12  ;;  %v114_v17 = vld [vmem:[%s1559_s2 + $0x270] sm:$0xff]  ;;  %369 = vmatprep.mubr.f32.mxu0 %v158_v15  ;;  %v113_v19 = vld [vmem:[%s1559_s2 + $0x268] sm:$0xff]  ;;  %v128_v20 = vld [vmem:[%s1559_s2 + $0x2e0] sm:$0xff]  ;;  %vm1069_vm1 = vmmov 0   ;;  %vm394_vm2 = vcmask 261120   ;;  %vm479_vm3 = vcmask 195584  }
  0x27   :  { %916 = vmatpush3.msra.mxu0 %v115_v14  ;;  %v112_v21 = vld [vmem:[%s1559_s2 + $0x260] sm:$0xff]  ;;  %v127_v22 = vld [vmem:[%s1559_s2 + $0x2d8] sm:$0xff]  ;;  %v126_v24 = vld [vmem:[%s1559_s2 + $0x2d0] sm:$0xff]  ;;  %972 = vmatprep.subr.mxu1 %v1068_v62  ;;  %vm565_vm4 = vcmask 785408   ;;  %vm678_vm5 = vcmask 257024   ;;  %vm703_vm6 = vcmask 261124  }
  0x28   :  { %917 = vmatprep.subr.mxu0 %v130_v16  ;;  %v111_v23 = vld [vmem:[%s1559_s2 + $0x258] sm:$0xff]  ;;  %v110_v25 = vld [vmem:[%s1559_s2 + $0x250] sm:$0xff]  ;;  %v125_v26 = vld [vmem:[%s1559_s2 + $0x2c8] sm:$0xff]  ;;  %980 = vmatprep.mubr.msk.f32.mxu1 %vm1069_vm1, %v1068_v62  ;;  %vm820_vm7 = vcmask 1041409   ;;  %vm823_vm8 = vcmask 25600  }
  0x29   :  { %918 = vmatpush3.msra.mxu0 %v114_v17  ;;  %v109_v27 = vld [vmem:[%s1559_s2 + $0x248] sm:$0xff]  ;;  %v124_v28 = vld [vmem:[%s1559_s2 + $0x2c0] sm:$0xff]  ;;  %v123_v30 = vld [vmem:[%s1559_s2 + $0x2b8] sm:$0xff] }
  0x2a   :  { %919 = vmatprep.subr.mxu0 %v129_v18  ;;  %v108_v29 = vld [vmem:[%s1559_s2 + $0x240] sm:$0xff]  ;;  %v107_v31 = vld [vmem:[%s1559_s2 + $0x238] sm:$0xff]  ;;  %v122_v33 = vld [vmem:[%s1559_s2 + $0x2b0] sm:$0xff] }
  0x2b   :  { %920 = vmatpush3.msra.mxu0 %v113_v19  ;;  %v106_v34 = vld [vmem:[%s1559_s2 + $0x230] sm:$0xff]  ;;  %v121_v35 = vld [vmem:[%s1559_s2 + $0x2a8] sm:$0xff]  ;;  %v120_v37 = vld [vmem:[%s1559_s2 + $0x2a0] sm:$0xff] }
  0x2c   :  { %921 = vmatprep.subr.mxu0 %v128_v20  ;;  %v105_v36 = vld [vmem:[%s1559_s2 + $0x228] sm:$0xff]  ;;  %v104_v38 = vld [vmem:[%s1559_s2 + $0x220] sm:$0xff]  ;;  %v119_v39 = vld [vmem:[%s1559_s2 + $0x298] sm:$0xff] }
  0x2d   :  { %922 = vmatpush3.msra.mxu0 %v112_v21  ;;  %v103_v40 = vld [vmem:[%s1559_s2 + $0x218] sm:$0xff]  ;;  %v118_v41 = vld [vmem:[%s1559_s2 + $0x290] sm:$0xff]  ;;  %v117_v44 = vld [vmem:[%s1559_s2 + $0x288] sm:$0xff] }
  0x2e   :  { %923 = vmatprep.subr.mxu0 %v127_v22  ;;  %v102_v43 = vld [vmem:[%s1559_s2 + $0x210] sm:$0xff]  ;;  %v101_v45 = vld [vmem:[%s1559_s2 + $0x208] sm:$0xff]  ;;  %v116_v46 = vld [vmem:[%s1559_s2 + $0x280] sm:$0xff] }
  0x2f   :  { %924 = vmatpush3.msra.mxu0 %v111_v23  ;;  %v100_v47 = vld [vmem:[%s1559_s2 + $0x200] sm:$0xff]  ;;  %v386_v61 = vld [vmem:[%s1560_s3 + $0x18] sm:$0xff]  ;;  %v385_v63 = vld [vmem:[%s1560_s3 + $0x10] sm:$0xff] }
  0x30   :  { %925 = vmatprep.subr.mxu0 %v126_v24  ;;  %973 = vmatpush3.msra.mxu1 %v386_v61  ;;  %v384_v0 = vld [vmem:[%s1560_s3 + $0x8] sm:$0xff]  ;;  %v383_v1 = vld [vmem:[%s1560_s3] sm:$0xff]  ;;  %v471_v6 = vld [vmem:[%s1562_s5 + $0x10] sm:$0xff] }
  0x31   :  { %926 = vmatpush3.msra.mxu0 %v110_v25  ;;  %974 = vmatprep.subr.mxu1 %v1068_v62  ;;  %v470_v7 = vld [vmem:[%s1562_s5 + $0x8] sm:$0xff]  ;;  %v469_v8 = vld [vmem:[%s1562_s5] sm:$0xff]  ;;  %v564_v14 = vld [vmem:[%s1564_s7 + $0x58] sm:$0xff]  ;;  %s1073_s5 = smov [#allocation3]  }
  0x32   :  { %927 = vmatprep.subr.mxu0 %v125_v26  ;;  %975 = vmatpush3.msra.mxu1 %v385_v63  ;;  %v840_v9 = vld [vmem:[%s1561_s4] ss:$0 sm:$0xff]  ;;  %v563_v15 = vld [vmem:[%s1564_s7 + $0x50] sm:$0xff]  ;;  %v562_v16 = vld [vmem:[%s1564_s7 + $0x48] sm:$0xff]  ;;  %s831_s30 = sshll.u32 %s1073_s5, 4  ;;  %s832_s30 = int_to_ptr.vmem [resolvable:$true] %s831_s30 }
  0x33   :  { %928 = vmatpush3.msra.mxu0 %v109_v27  ;;  %976 = vmatprep.subr.mxu1 %v1068_v62  ;;  %v561_v17 = vld [vmem:[%s1564_s7 + $0x40] sm:$0xff]  ;;  %v560_v18 = vld [vmem:[%s1564_s7 + $0x38] sm:$0xff]  ;;  %v559_v19 = vld [vmem:[%s1564_s7 + $0x30] sm:$0xff]  ;;  %s1045_s10 = scalar_lea.vmem %s832_s30, 32  ;;  %p1050_p1 = scmp.lt.s32.totalorder %s832_s30, %s832_s30 }
  0x34   :  { %929 = vmatprep.subr.mxu0 %v124_v28  ;;  %977 = vmatpush3.msra.mxu1 %v384_v0  ;;  %v558_v20 = vld [vmem:[%s1564_s7 + $0x28] sm:$0xff]  ;;  %v557_v21 = vld [vmem:[%s1564_s7 + $0x20] sm:$0xff]  ;;  %v556_v22 = vld [vmem:[%s1564_s7 + $0x18] sm:$0xff]  ;;  %p1046_p0 = scmp.ne.s32.totalorder %s832_s30, %s1045_s10  ;;  %p1051_p2 = scmp.lt.s32.totalorder %s1045_s10, %s1045_s10 }
  0x35   :  { %930 = vmatpush3.msra.mxu0 %v108_v29  ;;  %978 = vmatprep.subr.mxu1 %v1068_v62  ;;  %v555_v23 = vld [vmem:[%s1564_s7 + $0x10] sm:$0xff]  ;;  %v554_v24 = vld [vmem:[%s1564_s7 + $0x8] sm:$0xff]  ;;  %v553_v25 = vld [vmem:[%s1564_s7] sm:$0xff]  ;;  %s1072_s7 = smov 96  }
  0x36   :  { %931 = vmatprep.subr.mxu0 %v123_v30  ;;  %979 = vmatpush3.msra.mxu1 %v383_v1  ;;  %v842_v26 = vld [vmem:[%s1563_s6] ss:$0 sm:$0xff]  ;;  %v1070_v30 = vmov 1966171168   ;;  %s1071_s6 = smov 64   ;;  %p1052_p3 = por %p1051_p2, %p1050_p1 }
  0x37   :  { %932 = vmatpush3.msra.mxu0 %v107_v31  ;;  %983 = vmatprep.subr.mxu1 %v1068_v62  ;;  %v643_v31 = vunpack.c.l.s4 %v1070_v30 }
  0x38   :  { %933 = vmatprep.subr.mxu0 %v122_v33  ;;  %p1053_p4 = pnand %p1052_p3, %p1046_p0 }
  0x39   :  { %934 = vmatpush3.msra.mxu0 %v106_v34  ;;  %v644_v33 = vunpack.c.0.s8 %v643_v31 }
  0x3a   :  { %935 = vmatprep.subr.mxu0 %v121_v35 }
  0x3b   :  { %936 = vmatpush3.msra.mxu0 %v105_v36  ;;  %v1519_v34 = vsub.s32 %v644_v33, %v1239_v42 }
  0x3c   :  { %937 = vmatprep.subr.mxu0 %v120_v37 }
  0x3d   :  { %938 = vmatpush3.msra.mxu0 %v104_v38 }
  0x3e   :  { %939 = vmatprep.subr.mxu0 %v119_v39 }
  0x3f   :  { %940 = vmatpush3.msra.mxu0 %v103_v40  ;;  %v1524_v40 = vsub.s32 0, %v1239_v42 }
  0x40   :  { %941 = vmatprep.subr.mxu0 %v118_v41 }
  0x41   :  { %942 = vmatpush3.msra.mxu0 %v102_v43 }
  0x42   :  { %943 = vmatprep.subr.mxu0 %v117_v44 }
  0x43   :  { %944 = vmatpush3.msra.mxu0 %v101_v45  ;;  %v639_v45 = vld [vmem:[%s1565_s8] sm:$0xff] }
  0x44   :  { %945 = vmatprep.subr.mxu0 %v116_v46 }
  0x45   :  { %946 = vmatpush3.msra.mxu0 %v100_v47 }
  0x46   :  { %370 = vmatmul.mubr.f32.vlgmr.msra.gmra.mxu0 %v1329_v13 }
  0xe5   :  { %v877_v48 = vpop.f32.mrf.mxu0  ;;  %v912_v49 = vpop.f32.mrf.mxu1 }
  0xe7   :  { %v878_v50 = vpop.f32.mrf.mxu0  ;;  %v913_v51 = vpop.f32.mrf.mxu1 }
  0xe8   :  { %v879_v52 = vadd.f32 %v878_v50, %v877_v48  ;;  %v914_v53 = vadd.f32 %v913_v51, %v912_v49 }
  0xea   :  { %v302_v56 = vadd.f32 %v914_v53, %v879_v52  ;;  %v640_v52 = vld [vmem:[%s1565_s8 + $0x8] sm:$0xf] }
 0x106   :  { %v947_v54 = vpop.f32.mrf.mxu0 }
 0x108   :  { %v948_v55 = vpop.f32.mrf.mxu0 }
 0x109   :  { %v949_v57 = vadd.f32 %v948_v55, %v947_v54 }
 0x10b   :  { %v372_v58 = vadd.f32 %v949_v57, %v302_v56 }
 0x10d   :  { %v375_v59 = vmul.f32 %v372_v58, %v372_v58 }
 0x10f   :  { %v377_v60 = vsel %vm376_vm0, %v375_v59, 0.0 }
 0x110   :  { %378 = vadd.xlane.f32.xlu0 %v377_v60 }
 0x199   :  { %v379_v2 = vpop.xlane.xlu0 %378 }
 0x19a   :  { %v380_v3 = vadd.f32 1e-12, %v379_v2 }
 0x19c   :  { %1027 = vrsqrt.f32 %v380_v3 }
 0x1a9   :  { %v1028_v4 = vpop.eup %1027 }
 0x1aa   :  { %v1446_v5 = vmul.f32 %v1028_v4, %v372_v58 }
 0x1ac   :  { %981 = vmatmul.mubr.msk.f32.vlgmr.msra.gmra.mxu1 %vm394_vm2, %v1446_v5 }
 0x1ad   :  { %989 = vmatprep.mubr.msk.f32.mxu1 %vm1069_vm1, %v1068_v62  ;;  %984 = vmatpush3.msra.mxu1 %v471_v6 }
 0x1ae   :  { %985 = vmatprep.subr.mxu1 %v1068_v62 }
 0x1af   :  { %986 = vmatpush3.msra.mxu1 %v470_v7 }
 0x1b0   :  { %987 = vmatprep.subr.mxu1 %v1068_v62 }
 0x1b1   :  { %988 = vmatpush3.msra.mxu1 %v469_v8 }
 0x1b2   :  { %992 = vmatprep.subr.mxu1 %v1068_v62 }
 0x26c   :  { %v464_v10 = vpop.f32.mrf.mxu1 }
 0x26d   :  { %v465_v11 = vadd.f32 %v840_v9, %v464_v10 }
 0x26e   :  { %v982_v12 = vpop.f32.mrf.mxu1 }
 0x26f   :  { %v468_v13 = vmax.f32 %v465_v11, 0.0 }
 0x271   :  { %990 = vmatmul.mubr.msk.f32.vlgmr.msra.gmra.mxu1 %vm479_vm3, %v468_v13 }
 0x272   :  { %993 = vmatpush3.msra.mxu1 %v564_v14  ;;  %1016 = vmatprep.mubr.msk.f32.mxu1 %vm1069_vm1, %v1068_v62 }
 0x273   :  { %994 = vmatprep.subr.mxu1 %v1068_v62 }
 0x274   :  { %995 = vmatpush3.msra.mxu1 %v563_v15 }
 0x275   :  { %996 = vmatprep.subr.mxu1 %v1068_v62 }
 0x276   :  { %997 = vmatpush3.msra.mxu1 %v562_v16 }
 0x277   :  { %998 = vmatprep.subr.mxu1 %v1068_v62 }
 0x278   :  { %999 = vmatpush3.msra.mxu1 %v561_v17 }
 0x279   :  { %1000 = vmatprep.subr.mxu1 %v1068_v62 }
 0x27a   :  { %1001 = vmatpush3.msra.mxu1 %v560_v18 }
 0x27b   :  { %1002 = vmatprep.subr.mxu1 %v1068_v62 }
 0x27c   :  { %1003 = vmatpush3.msra.mxu1 %v559_v19 }
 0x27d   :  { %1004 = vmatprep.subr.mxu1 %v1068_v62 }
 0x27e   :  { %1005 = vmatpush3.msra.mxu1 %v558_v20 }
 0x27f   :  { %1006 = vmatprep.subr.mxu1 %v1068_v62 }
 0x280   :  { %1007 = vmatpush3.msra.mxu1 %v557_v21 }
 0x281   :  { %1008 = vmatprep.subr.mxu1 %v1068_v62 }
 0x282   :  { %1009 = vmatpush3.msra.mxu1 %v556_v22 }
 0x283   :  { %1010 = vmatprep.subr.mxu1 %v1068_v62 }
 0x284   :  { %1011 = vmatpush3.msra.mxu1 %v555_v23 }
 0x285   :  { %1012 = vmatprep.subr.mxu1 %v1068_v62 }
 0x286   :  { %1013 = vmatpush3.msra.mxu1 %v554_v24 }
 0x287   :  { %1014 = vmatprep.subr.mxu1 %v1068_v62 }
 0x288   :  { %1015 = vmatpush3.msra.mxu1 %v553_v25 }
 0x331   :  { %v549_v27 = vpop.f32.mrf.mxu1 }
 0x332   :  { %v550_v28 = vadd.f32 %v842_v26, %v549_v27 }
 0x333   :  { %v991_v29 = vpop.f32.mrf.mxu1 }
 0x334   :  { %1017 = vmatmul.mubr.msk.f32.vlgmr.msra.gmra.mxu1 %vm565_vm4, %v550_v28 }
 0x3f4   :  { %v635_v35 = vpop.f32.mrf.mxu1 }
 0x3f5   :  { %v648_v36 = vrot.slane %v635_v35, %v1519_v34 }
 0x3f6   :  { %v1018_v37 = vpop.f32.mrf.mxu1 }
 0x3f7   :  { %v649_v38 = vcombine.high %v648_v36, %v648_v36  ;;  %v656_v39 = vrot.slane %v648_v36, %v1519_v34 }
 0x3f9   :  { %v663_v41 = vrot.slane %v649_v38, %v1519_v34  ;;  %v667_v43 = vrot.slane %v656_v39, %v1524_v40 }
 0x3fb   :  { %724 = vrot.lane.b32.xlu1 %v667_v43, %s1071_s6  ;;  %693 = vrot.lane.b32.xlu0 %v667_v43, %s1072_s7  ;;  %v671_v44 = vrot.slane %v663_v41, %v1524_v40  ;;  %v674_v46 = vadd.f32 %v667_v43, %v639_v45 }
 0x3fd   :  { %v676_v47 = vmul.f32 %v674_v46, %v674_v46  ;;  %v675_v48 = vadd.f32 %v671_v44, %v639_v45 }
 0x3ff   :  { %695 = vrot.lane.b32.xlu1 %v671_v44, %s1072_s7  ;;  %v679_v49 = vsel %vm678_vm5, %v676_v47, 0.0  ;;  %v677_v50 = vmul.f32 %v675_v48, %v675_v48 }
 0x401   :  { %v682_v51 = vsel %vm678_vm5, %v677_v50, 0.0  ;;  %v770_v50 = vrot.slane %v1446_v5, %v1519_v34 }
 0x403   :  { %726 = vrot.lane.b32.xlu1 %v671_v44, %s1071_s6 }
 0x427   :  { %680 = vadd.xlane.f32.xlu1 %v679_v49 }
 0x42b   :  { %683 = vadd.xlane.f32.xlu1 %v682_v51  ;;  %v771_v51 = vcombine.high %v770_v50, %v770_v50 }
 0x46d   :  { %v725_v53 = vpop.permute.xlu1 %724  ;;  %v694_v54 = vpop.permute.xlu0 %693 }
 0x46e   :  { %v730_v55 = vadd.f32 %v725_v53, %v640_v52  ;;  %v699_v56 = vadd.f32 %v694_v54, %v639_v45  ;;  %v785_v54 = vrot.slane %v771_v51, %v1519_v34 }
 0x470   :  { %v701_v57 = vmul.f32 %v699_v56, %v699_v56  ;;  %v732_v61 = vmul.f32 %v730_v55, %v730_v55 }
 0x471   :  { %v696_v58 = vpop.permute.xlu1 %695 }
 0x472   :  { %v700_v59 = vadd.f32 %v696_v58, %v639_v45  ;;  %v704_v60 = vsel %vm703_vm6, %v701_v57, 0.0  ;;  %v734_v2 = vsel %vm678_vm5, %v732_v61, 0.0 }
 0x473   :  { %705 = vadd.xlane.f32.xlu1 %v704_v60  ;;  %v793_v60 = vrot.slane %v785_v54, %v1524_v40 }
 0x474   :  { %v702_v62 = vmul.f32 %v700_v59, %v700_v59 }
 0x475   :  { %v727_v63 = vpop.permute.xlu1 %726 }
 0x476   :  { %v731_v0 = vadd.f32 %v727_v63, %v640_v52  ;;  %v707_v1 = vsel %vm703_vm6, %v702_v62, 0.0  ;;  %v778_v52 = vrot.slane %v770_v50, %v1519_v34  ;;  %v811_v63 = vand.u32 127, %v138_v32 }
 0x477   :  { %708 = vadd.xlane.f32.xlu0 %v707_v1  ;;  %735 = vadd.xlane.f32.xlu1 %v734_v2  ;;  %v805_v34 = vstv %s1557_s0 }
 0x478   :  { %v733_v3 = vmul.f32 %v731_v0, %v731_v0  ;;  %v814_v1 = vsub.s32 %v811_v63, %v1239_v42 }
 0x47a   :  { %v737_v4 = vsel %vm678_vm5, %v733_v3, 0.0 }
 0x47b   :  { %738 = vadd.xlane.f32.xlu0 %v737_v4 }
 0x4b0   :  { %v681_v6 = vpop.xlane.xlu1 %680 }
 0x4b1   :  { %v685_v8 = vadd.f32 1e-12, %v681_v6 }
 0x4b3   :  { %1029 = vrsqrt.f32 %v685_v8 }
 0x4b4   :  { %v684_v7 = vpop.xlane.xlu1 %683 }
 0x4b5   :  { %v686_v11 = vadd.f32 1e-12, %v684_v7 }
 0x4c0   :  { %v1030_v18 = vpop.eup %1029 }
 0x4c1   :  { %v689_v22 = vmul.f32 %v1030_v18, %v674_v46 }
 0x4fc   :  { %v706_v9 = vpop.xlane.xlu1 %705 }
 0x4fd   :  { %v710_v10 = vadd.f32 1e-12, %v706_v9 }
 0x4ff   :  { %1031 = vrsqrt.f32 %v710_v10 }
 0x500   :  { %v709_v12 = vpop.xlane.xlu0 %708  ;;  %v736_v13 = vpop.xlane.xlu1 %735  ;;  %1033 = vrsqrt.f32 %v686_v11 }
 0x501   :  { %v711_v14 = vadd.f32 1e-12, %v709_v12  ;;  %v740_v15 = vadd.f32 1e-12, %v736_v13 }
 0x503   :  { %1035 = vrsqrt.f32 %v711_v14 }
 0x504   :  { %1037 = vrsqrt.f32 %v740_v15  ;;  %v739_v16 = vpop.xlane.xlu0 %738 }
 0x505   :  { %v741_v17 = vadd.f32 1e-12, %v739_v16 }
 0x507   :  { %1039 = vrsqrt.f32 %v741_v17 }
 0x50c   :  { %v1032_v19 = vpop.eup %1031 }
 0x50d   :  { %v714_v20 = vmul.f32 %v1032_v19, %v699_v56  ;;  %v1034_v21 = vpop.eup %1033  ;;  %v789_v56 = vrot.slane %v778_v52, %v1524_v40 }
 0x50e   :  { %v690_v29 = vmul.f32 %v1034_v21, %v675_v48 }
 0x50f   :  { %v718_v23 = vrot.slane %v714_v20, 4 }
 0x510   :  { %v1036_v24 = vpop.eup %1035 }
 0x511   :  { %v1038_v25 = vpop.eup %1037  ;;  %v722_v26 = vadd.f32 %v718_v23, %v689_v22  ;;  %v715_v27 = vmul.f32 %v1036_v24, %v700_v59 }
 0x512   :  { %v744_v28 = vmul.f32 %v1038_v25, %v730_v55 }
 0x513   :  { %v719_v30 = vrot.slane %v715_v27, 4 }
 0x514   :  { %v1040_v31 = vpop.eup %1039  ;;  %v746_v33 = vadd.f32 %v744_v28, %v722_v26 }
 0x515   :  { %v723_v35 = vadd.f32 %v719_v30, %v690_v29  ;;  %v745_v36 = vmul.f32 %v1040_v31, %v731_v0 }
 0x516   :  { %v748_v37 = vmul.f32 0.33333334, %v746_v33 }
 0x517   :  { %v747_v38 = vadd.f32 %v745_v36, %v723_v35 }
 0x518   :  { %v750_v39 = vmul.f32 %v748_v37, %v748_v37 }
 0x519   :  { %v749_v41 = vmul.f32 0.33333334, %v747_v38 }
 0x51a   :  { %v752_v43 = vsel %vm678_vm5, %v750_v39, 0.0 }
 0x51b   :  { %753 = vadd.xlane.f32.xlu1 %v752_v43  ;;  %v751_v44 = vmul.f32 %v749_v41, %v749_v41 }
 0x51d   :  { %v755_v45 = vsel %vm678_vm5, %v751_v44, 0.0 }
 0x51e   :  { %756 = vadd.xlane.f32.xlu0 %v755_v45 }
 0x5a4   :  { %v754_v46 = vpop.xlane.xlu1 %753 }
 0x5a5   :  { %v758_v47 = vadd.f32 1e-12, %v754_v46 }
 0x5a7   :  { %1041 = vrsqrt.f32 %v758_v47  ;;  %v757_v48 = vpop.xlane.xlu0 %756 }
 0x5a8   :  { %v759_v49 = vadd.f32 1e-12, %v757_v48 }
 0x5aa   :  { %1043 = vrsqrt.f32 %v759_v49 }
 0x5b4   :  { %v1042_v53 = vpop.eup %1041 }
 0x5b5   :  { %v762_v55 = vmul.f32 %v1042_v53, %v748_v37 }
 0x5b7   :  { %v1044_v57 = vpop.eup %1043  ;;  %v796_v58 = vmul.f32 %v789_v56, %v762_v55 }
 0x5b8   :  { %v763_v59 = vmul.f32 %v1044_v57, %v749_v41 }
 0x5b9   :  { %v798_v61 = vsel %vm678_vm5, %v796_v58, 0.0 }
 0x5ba   :  { %799 = vadd.xlane.f32.xlu1 %v798_v61  ;;  %v797_v62 = vmul.f32 %v793_v60, %v763_v59 }
 0x5bc   :  { %v801_v5 = vsel %vm678_vm5, %v797_v62, 0.0 }
 0x5bd   :  { %802 = vadd.xlane.f32.xlu0 %v801_v5 }
 0x643   :  { %v800_v0 = vpop.xlane.xlu1 %799 }
 0x644   :  { %v806_v2 = vmul.f32 %v805_v34, %v800_v0 }
 0x646   :  { %v803_v3 = vpop.xlane.xlu0 %802  ;;  %v815_v40 = vrot.slane %v806_v2, %v814_v1 }
 0x647   :  { %v807_v4 = vmul.f32 %v805_v34, %v803_v3 }
 0x649   :  { %v819_v6 = vrot.slane %v807_v4, %v814_v1 }
 0x64b   :  { %v821_v7 = vsel %vm820_vm7, %v819_v6, %v815_v40 }
 0x64c   :  { %824 = vst.msk [vmem:[#allocation3] sm:$0x3] %vm823_vm8, %v821_v7 }
 0x64d   :  { %1056 = shalt.err (!%p1053_p4)
}
 0x64e   :  { %834 = dma.vmem_to_hbm [thread:$0]  %s832_s30, 32, %s1566_s9, [#allocation4]  }
 0x64f   :  { %1065 = dma.done.wait [#allocation4], 32  }
 0x650   :  { %1066 = vsyncadd [#allocation4], 4294967264 }
 0x651   :  { %838 = vsyncpa [#allocation4], 1 }

</bundles_post_ra>
